<compile_context>
chip_gen: v7x
topology: tpu7x:2x2x1
jax: 0.10.0
libtpu: 0.0.40
codegen_flags: <defaults>
</compile_context>

<pallas_src>
import jax
import jax.numpy as jnp
from jax.experimental import pallas as pl
from jax.experimental.pallas import tpu as pltpu

# Small, forward-implied shapes
N = 8            # number of nodes
HIDDEN = 32      # hidden_dim
OUT_DIM = 1      # output_dim (must be 1 for squeeze(2) + scalar mean to match PyTorch)
NUM_LAYERS = 2   # -> 3 Linear layers total: H->H, H->H, H->1
ACTI = "relu"

# Packed parameter-slab row layout:
#   rows [0, H)        : w1  (H, H), stored (in, out)
#   rows [H, 2H)       : w2  (H, H)
#   row   2H           : b1  (1, H)
#   row   2H + 1       : b2  (1, H)
#   row   2H + 2       : w3[:, 0] / N  (1, H)   -- mean's 1/N folded in
#   rows up to 2H + 8  : zero padding (sublane-tile aligned tail)
_SLAB_ROWS = 2 * HIDDEN + 8          # 72, multiple of 8 sublanes


def decoder_kernel(x_ref, p_ref, b3_ref, out_ref):
    # x_ref:   (N, H)          f32 VMEM  node features
    # p_ref:   (2H + 8, H)     f32 VMEM  packed [w1, w2, b1, b2, w3/N, pad]
    # b3_ref:  (1, 1)          f32 SMEM  final-layer bias
    # out_ref: (1, 1)          f32 SMEM  scalar output
    x = x_ref[...]                                      # (N, H)

    w1 = p_ref[0:HIDDEN, :]                             # (H, H), tile-aligned view
    w2 = p_ref[HIDDEN:2 * HIDDEN, :]                    # (H, H), tile-aligned view
    tail = p_ref[2 * HIDDEN:2 * HIDDEN + 8, :]          # (8, H) aligned sublane tile
    b1 = tail[0:1, :]                                   # (1, H)
    b2 = tail[1:2, :]                                   # (1, H)
    w3_row = tail[2:3, :]                               # (1, H) == w3[:, 0] / N

    # Layer 1: Linear(H, H) + ReLU
    h = jnp.dot(x, w1, preferred_element_type=jnp.float32) + b1
    h = jnp.maximum(h, 0.0)

    # Layer 2 (num_layers - 1 = 1 hidden layer): Linear(H, H) + ReLU
    h = jnp.dot(h, w2, preferred_element_type=jnp.float32) + b2
    h = jnp.maximum(h, 0.0)

    # Final Linear(H, 1) + mean over nodes, folded into a VPU/XLU reduction:
    #   mean_i( sum_j h[i,j]*w3[j] + b3 ) == sum_j( sum_i h[i,j] ) * (w3[j]/N) + b3
    col_sum = jnp.sum(h, axis=0, keepdims=True)          # (1, H) sublane (XLU) reduce
    out_ref[0, 0] = jnp.sum(col_sum * w3_row) + b3_ref[0, 0]


def pack_params(params):
    """One-time packing of the raw Linear params into kernel-ready arrays."""
    w1, b1, w2, b2, w3, b3 = params
    assert w3.shape[1] == OUT_DIM == 1 and b3.shape == (1, 1), (
        "kernel packing assumes output_dim == 1")
    w3_row = (w3[:, 0:1].T / float(N)).astype(jnp.float32)       # (1, H), 1/N folded
    slab = jnp.concatenate([w1, w2, b1, b2, w3_row], axis=0)     # (2H + 3, H)
    slab = jnp.pad(slab, ((0, _SLAB_ROWS - slab.shape[0]), (0, 0)))
    b3_s = b3.reshape(1, 1).astype(jnp.float32)
    return slab.astype(jnp.float32), b3_s


@jax.jit
def decoder_forward_packed(node_features, slab, b3_s):
    """node_features: (1, N, H) f32; slab/b3_s from pack_params -> (1,) f32."""
    x2d = node_features[0]                               # (N, H): squeeze batch dim of 1
    out = pl.pallas_call(
        decoder_kernel,
        out_shape=jax.ShapeDtypeStruct((1, 1), jnp.float32),
        # No grid: single invocation, whole arrays VMEM-resident, no pipeline.
        in_specs=[
            pl.BlockSpec(memory_space=pltpu.MemorySpace.VMEM),   # x
            pl.BlockSpec(memory_space=pltpu.MemorySpace.VMEM),   # packed weights/biases
            pl.BlockSpec(memory_space=pltpu.MemorySpace.SMEM),   # b3 scalar
        ],
        out_specs=pl.BlockSpec(memory_space=pltpu.MemorySpace.SMEM),
    )(x2d, slab, b3_s)
    # matches PyTorch: torch.mean(...).flatten().float() -> shape (1,), float32
    return out.reshape((1,)).astype(jnp.float32)


def decoder_forward(node_features, params):
    """Convenience wrapper (packs every call); prefer pre-packing + the jitted fn."""
    slab, b3_s = pack_params(params)
    return decoder_forward_packed(node_features, slab, b3_s)


def init_params(key):
    """Deterministic parameter init (Kaiming-uniform-ish, like nn.Linear defaults)."""
    def linear(key, fan_in, fan_out):
        kw, kb = jax.random.split(key)
        bound = 1.0 / jnp.sqrt(fan_in)
        w = jax.random.uniform(kw, (fan_in, fan_out), jnp.float32, -bound, bound)
        b = jax.random.uniform(kb, (1, fan_out), jnp.float32, -bound, bound)
        return w, b

    k1, k2, k3 = jax.random.split(key, 3)
    w1, b1 = linear(k1, HIDDEN, HIDDEN)
    w2, b2 = linear(k2, HIDDEN, HIDDEN)
    w3, b3 = linear(k3, HIDDEN, OUT_DIM)
    return (w1, b1, w2, b2, w3, b3)


def decoder_reference(node_features, params):
    """Pure-JAX reference for correctness checking."""
    w1, b1, w2, b2, w3, b3 = params
    x = node_features[0]
    h = jnp.maximum(x @ w1 + b1, 0.0)
    h = jnp.maximum(h @ w2 + b2, 0.0)
    y = h @ w3 + b3                      # (N, 1)
    y = y.squeeze(-1)                    # squeeze(2) then squeeze(0) on (1, N, 1)
    return jnp.mean(y).reshape((1,)).astype(jnp.float32)


if __name__ == "__main__":
    key = jax.random.PRNGKey(0)
    k_params, k_x = jax.random.split(key)

    params = init_params(k_params)
    node_features = jax.random.normal(k_x, (1, N, HIDDEN), jnp.float32)

    # Pack once at init time; the forward path only launches the kernel.
    slab, b3_s = pack_params(params)

    out = decoder_forward_packed(node_features, slab, b3_s)
    out = jax.block_until_ready(out)

    ref = decoder_reference(node_features, params)
    assert out.shape == (1,) and out.dtype == jnp.float32
    assert jnp.allclose(out, ref, atol=1e-5, rtol=1e-5), (out, ref)

    print("KERNEL_OK")
</pallas_src>

<mosaic_0001>
module attributes {stable_mosaic.version = 11 : i64} {
  func.func @decoder_kernel(%arg0: memref<8x32xf32, #tpu.memory_space<vmem>>, %arg1: memref<72x32xf32, #tpu.memory_space<vmem>>, %arg2: memref<1x1xf32, #tpu.memory_space<smem>>, %arg3: memref<1x1xf32, #tpu.memory_space<smem>>) attributes {dimension_semantics = [], scalar_prefetch = 0 : i64, scratch_operands = 0 : i64, tpu.core_type = #tpu.core_type<tc>} {
    %c0 = arith.constant 0 : index
    %c0_0 = arith.constant 0 : index
    %0 = vector.load %arg0[%c0, %c0_0] : memref<8x32xf32, #tpu.memory_space<vmem>>, vector<8x32xf32>
    %c0_1 = arith.constant 0 : index
    %c0_2 = arith.constant 0 : index
    %1 = vector.load %arg1[%c0_1, %c0_2] : memref<72x32xf32, #tpu.memory_space<vmem>>, vector<32x32xf32>
    %c32 = arith.constant 32 : index
    %c0_3 = arith.constant 0 : index
    %2 = vector.load %arg1[%c32, %c0_3] : memref<72x32xf32, #tpu.memory_space<vmem>>, vector<32x32xf32>
    %c64 = arith.constant 64 : index
    %c0_4 = arith.constant 0 : index
    %3 = vector.load %arg1[%c64, %c0_4] : memref<72x32xf32, #tpu.memory_space<vmem>>, vector<8x32xf32>
    %4 = vector.extract_strided_slice %3 {offsets = [0, 0], sizes = [1, 32], strides = [1, 1]} : vector<8x32xf32> to vector<1x32xf32>
    %5 = vector.extract_strided_slice %3 {offsets = [1, 0], sizes = [1, 32], strides = [1, 1]} : vector<8x32xf32> to vector<1x32xf32>
    %6 = vector.extract_strided_slice %3 {offsets = [2, 0], sizes = [1, 32], strides = [1, 1]} : vector<8x32xf32> to vector<1x32xf32>
    %cst = arith.constant dense<0.000000e+00> : vector<8x32xf32>
    %7 = tpu.matmul %0, %1, %cst {dimension_numbers = #tpu.dot_dimension_numbers<[1], [0], [0], [1], [0, 0, 1, 1], [], []>} : vector<8x32xf32>, vector<32x32xf32>, vector<8x32xf32> -> vector<8x32xf32>
    %8 = vector.broadcast %4 : vector<1x32xf32> to vector<8x32xf32>
    %9 = arith.addf %7, %8 : vector<8x32xf32>
    %cst_5 = arith.constant 0.000000e+00 : f32
    %10 = vector.broadcast %cst_5 : f32 to vector<8x32xf32>
    %11 = arith.maximumf %9, %10 : vector<8x32xf32>
    %cst_6 = arith.constant dense<0.000000e+00> : vector<8x32xf32>
    %12 = tpu.matmul %11, %2, %cst_6 {dimension_numbers = #tpu.dot_dimension_numbers<[1], [0], [0], [1], [0, 0, 1, 1], [], []>} : vector<8x32xf32>, vector<32x32xf32>, vector<8x32xf32> -> vector<8x32xf32>
    %13 = vector.broadcast %5 : vector<1x32xf32> to vector<8x32xf32>
    %14 = arith.addf %12, %13 : vector<8x32xf32>
    %cst_7 = arith.constant 0.000000e+00 : f32
    %15 = vector.broadcast %cst_7 : f32 to vector<8x32xf32>
    %16 = arith.maximumf %14, %15 : vector<8x32xf32>
    %cst_8 = arith.constant dense<0.000000e+00> : vector<32xf32>
    %17 = vector.multi_reduction <add>, %16, %cst_8 [0] : vector<8x32xf32> to vector<32xf32>
    %18 = vector.shape_cast %17 : vector<32xf32> to vector<1x32xf32>
    %19 = arith.mulf %18, %6 : vector<1x32xf32>
    %20 = vector.shape_cast %19 : vector<1x32xf32> to vector<1x1x32xf32>
    %cst_9 = arith.constant dense<0.000000e+00> : vector<1xf32>
    %21 = vector.multi_reduction <add>, %20, %cst_9 [1, 2] : vector<1x1x32xf32> to vector<1xf32>
    %22 = vector.shape_cast %21 : vector<1xf32> to vector<1x1x1xf32>
    %23 = vector.extract %22[0, 0, 0] : f32 from vector<1x1x1xf32>
    %c0_10 = arith.constant 0 : index
    %c0_11 = arith.constant 0 : index
    %24 = memref.load %arg2[%c0_10, %c0_11] : memref<1x1xf32, #tpu.memory_space<smem>>
    %25 = arith.addf %23, %24 : f32
    %c0_12 = arith.constant 0 : index
    %c0_13 = arith.constant 0 : index
    %26 = memref.load %arg3[%c0_12, %c0_13] : memref<1x1xf32, #tpu.memory_space<smem>>
    memref.store %25, %arg3[%c0_12, %c0_13] : memref<1x1xf32, #tpu.memory_space<smem>>
    return
  }
}

</mosaic_0001>

<bundles_post_ra>
// kernel: decoder_forward_packed.1
= control target key start
LH: loop header
LB: loop body
LE: loop exit
PB: predicated region body
PF: predicated region fallthrough
CT: control target
= control target key end

     0   :  { %v286_v3 = vmov 0.0|0.0   ;;  %vm287_vm0 = vmmov 0   ;;  %v288_v6 = vmov 0.0   ;;  %s358_s0 = inlined_call_operand.vmem [shape: f32[8,32], index: 0, kind: input, shape index: {}]   ;;  %s359_s1 = inlined_call_operand.vmem [shape: f32[72,32], index: 1, kind: input, shape index: {}]   ;;  %s360_s2 = inlined_call_operand.<no memory space> [shape: f32[1,1], index: 2, kind: input, shape index: {}]   ;;  %s361_s3 = inlined_call_operand.hbm [shape: f32[1,1], index: 3, kind: output, shape index: {}]  }
   0x1   :  { %v17_v0 = vld [vmem:[%s359_s1] sm:$0xff]  ;;  %v18_v1 = vld [vmem:[%s359_s1 + $0x8] sm:$0xff]  ;;  %v19_v2 = vld [vmem:[%s359_s1 + $0x10] sm:$0xff]  ;;  %256 = vmatprep.subr.bf16.mxu0 %v286_v3  ;;  %242 = vmatprep.mubr.msk.f32.mxu0 %vm287_vm0, %v288_v6 }
   0x2   :  { %v257_v4 = vpack.c.bf16 %v18_v1, %v17_v0  ;;  %v20_v5 = vld [vmem:[%s359_s1 + $0x18] sm:$0xff]  ;;  %v21_v7 = vld [vmem:[%s359_s1 + $0x20] sm:$0xff]  ;;  %262 = vmatprep.subr.bf16.mxu1 %v286_v3  ;;  %v22_v8 = vld [vmem:[%s359_s1 + $0x28] sm:$0xff]  ;;  %253 = vmatprep.mubr.msk.f32.mxu1 %vm287_vm0, %v288_v6 }
   0x3   :  { %9 = vsyncpa [#allocation4], 0  ;;  %v260_v9 = vpack.c.bf16 %v20_v5, %v19_v2  ;;  %v263_v10 = vpack.c.bf16 %v22_v8, %v21_v7  ;;  %v16_v11 = vld [vmem:[%s358_s0] sm:$0xff]  ;;  %vm30_vm1 = vcmask 261120   ;;  %v23_v12 = vld [vmem:[%s359_s1 + $0x30] sm:$0xff]  ;;  %v26_v15 = vlaneseq  ;;  %s274_s9 = scalar_lea.hbm %s361_s3, 16 }
   0x4   :  { %258 = vmatpush3.bf16.msra.mxu0 %v257_v4  ;;  %v24_v13 = vld [vmem:[%s359_s1 + $0x38] sm:$0xff]  ;;  %v25_v18 = vld [vmem:[%s359_s1 + $0x40] sm:$0xff]  ;;  %vm194_vm2 = vcmask 253952   ;;  %p275_p0 = scmp.ne.s32.totalorder %s361_s3, %s274_s9  ;;  %p278_p1 = scmp.lt.u32.totalorder %s274_s9, %s361_s3 }
   0x5   :  { %259 = vmatprep.subr.bf16.mxu0 %v286_v3  ;;  %264 = vmatpush3.bf16.msra.mxu1 %v263_v10  ;;  %v266_v14 = vpack.c.bf16 %v24_v13, %v23_v12  ;;  %v27_v16 = vshrl.u32 %v26_v15, 7 }
   0x6   :  { %265 = vmatprep.subr.bf16.mxu1 %v286_v3  ;;  %p280_p2 = pnand %p278_p1, %p275_p0 }
   0x7   :  { %v28_v17 = vsub.s32 0, %v27_v16  ;;  %v107_v24 = vsub.s32 1, %v27_v16 }
   0x8   :  { %261 = vmatpush3.bf16.msra.mxu0 %v260_v9 }
   0x9   :  { %267 = vmatpush3.bf16.msra.mxu1 %v266_v14  ;;  %v29_v19 = vrot.slane %v25_v18, %v28_v17  ;;  %v108_v25 = vrot.slane %v25_v18, %v107_v24 }
   0xb   :  { %243 = vmatmul.mubr.msk.f32.vlgmr.msra.gmra.mrb[0].mxu0 %vm30_vm1, %v16_v11 }
  0xde   :  { %v100_v20 = vpop.f32.mrb[0].mxu0 }
  0xdf   :  { %v101_v21 = vadd.f32 %v100_v20, %v29_v19  ;;  %v244_v22 = vpop.f32.mrb[1].mxu0 }
  0xe1   :  { %v104_v23 = vmax.f32 %v101_v21, 0.0 }
  0xe3   :  { %254 = vmatmul.mubr.msk.f32.vlgmr.msra.gmra.mrb[0].mxu1 %vm30_vm1, %v104_v23 }
 0x1b6   :  { %v178_v26 = vpop.f32.mrb[0].mxu1 }
 0x1b7   :  { %v179_v27 = vadd.f32 %v178_v26, %v108_v25  ;;  %v255_v28 = vpop.f32.mrb[1].mxu1 }
 0x1b9   :  { %v182_v29 = vmax.f32 %v179_v27, 0.0 }
 0x1bb   :  { %v183_v30 = vsel %vm30_vm1, %v182_v29, 0.0 }
 0x1bc   :  { %v184_v31 = vrot.slane %v183_v30, 4 }
 0x1be   :  { %v185_v32 = vadd.f32 %v184_v31, %v183_v30 }
 0x1c0   :  { %v186_v33 = vrot.slane %v185_v32, 2 }
 0x1c2   :  { %v187_v34 = vadd.f32 %v186_v33, %v185_v32 }
 0x1c4   :  { %v188_v35 = vrot.slane %v187_v34, 1 }
 0x1c6   :  { %v189_v36 = vadd.f32 %v188_v35, %v187_v34 }
 0x1c8   :  { %v190_v37 = vmul.f32 %v189_v36, %v25_v18 }
 0x1ca   :  { %v192_v38 = vrot.slane %v190_v37, 2 }
 0x1cc   :  { %v195_v39 = vsel %vm194_vm2, %v192_v38, 0.0 }
 0x1cd   :  { %196 = vadd.xlane.f32.xlu0 %v195_v39 }
 0x25a   :  { %v197_v40 = vpop.xlane.xlu0 %196 }
 0x25b   :  { %v198_v41 = vrot.slane %v197_v40, 4 }
 0x25d   :  { %v199_v42 = vadd.f32 %v198_v41, %v197_v40 }
 0x25f   :  { %v200_v43 = vrot.slane %v199_v42, 2 }
 0x261   :  { %v201_v44 = vadd.f32 %v200_v43, %v199_v42 }
 0x263   :  { %v202_v45 = vrot.slane %v201_v44, 1 }
 0x265   :  { %v203_v46 = vadd.f32 %v202_v45, %v201_v44 }
 0x267   :  { %268 = vpush %v203_v46 }
 0x298   :  { %s269_s0 = spop %268 }
 0x299   :  { %s206_s6 = sadd.f32 %s269_s0, %s360_s2 }
 0x29b   :  { %208 = sst [smem:[#allocation3]] %s206_s6 }
 0x29c   :  { %283 = shalt.err (!%p280_p2)
}
 0x29d   :  { %s289_s14 = smov [#allocation3]  }
 0x29e   :  { %216 = dma.smem_to_hbm %s289_s14, 16, %s361_s3, [#allocation4]  }
 0x29f   :  { %284 = dma.done.wait [#allocation4], 16  }
 0x2a0   :  { %285 = vsyncadd [#allocation4], 4294967280 }
 0x2a1   :  { %220 = sfence }
 0x2a2   :  { %221 = vsyncpa [#allocation4], 1 }

</bundles_post_ra>
